<compile_context>
chip_gen: v6e
topology: v6e:2x2x1
jax: 0.10.0
libtpu: 0.0.40
codegen_flags: <defaults>
</compile_context>

<pallas_src>
import functools

import jax
import jax.numpy as jnp
from jax.experimental import pallas as pl
from jax.experimental.pallas import tpu as pltpu


def _round_up(a, b):
    return (a + b - 1) // b * b


def _convblock_kernel(x_ref, w_ref, b_ref, gamma_ref, shift_ref, o_ref, *,
                      TL, C_out, C_out_p8, n_groups):
    # x_ref:     (L_ph, W)          phase-major input for this batch element (VMEM resident)
    # w_ref:     (n_groups, W, C_pad)  conv weights per row-offset group (zero-padded lanes)
    # b_ref:     (1, C_pad)         conv bias (zero-padded)
    # gamma_ref: (1, C_pad)         LayerNorm scale (zero-padded)
    # shift_ref: (1, C_pad)         precomputed  time_proj(t_emb) + time_bias + ln_beta
    # o_ref:     (C_out_p8, TL)     NCL output tile (L on the 128-lane axis)
    base = pl.multiple_of(pl.program_id(1) * TL, TL)

    # Aligned dynamic window; the small per-tap (+0/+1/+2) shifts are static
    # value slices, so no unaligned dynamic sublane indexing is needed.
    win = x_ref[pl.ds(base, TL + 8), :]                       # (TL+8, W)

    # Conv1d as a sum of per-tap-group matmuls on the MXU (f32 accumulation).
    acc = jnp.dot(win[0:TL, :], w_ref[0],
                  preferred_element_type=jnp.float32)          # (TL, C_pad)
    for g in range(1, n_groups):
        acc = acc + jnp.dot(win[g:g + TL, :], w_ref[g],
                            preferred_element_type=jnp.float32)
    y = acc + b_ref[...]                                       # (TL, C_pad)

    # LayerNorm over the true C_out channels (padded lanes are exactly zero,
    # so plain sums divided by C_out give the correct moments). One pass.
    inv_c = 1.0 / C_out
    s1 = jnp.sum(y, axis=-1, keepdims=True)
    s2 = jnp.sum(y * y, axis=-1, keepdims=True)
    mean = s1 * inv_c
    var = jnp.maximum(s2 * inv_c - mean * mean, 0.0)
    y = (y - mean) * jax.lax.rsqrt(var + 1e-5)

    # affine + (hoisted) time projection, then SiLU
    y = y * gamma_ref[...] + shift_ref[...]
    y = y * jax.nn.sigmoid(y)

    # NCL writeback: transpose so L is the lane dim -> dense, unmasked stores.
    o_ref[...] = jnp.transpose(y)[:C_out_p8, :].astype(o_ref.dtype)


def conv_block_forward(x, t_emb, params, *, downsample=True):
    """x: (N, C_in, L) float32; t_emb: (N, embed_dim). Returns (N, C_out, L_out) (NCL)."""
    w_conv = params["conv_w"]        # (C_out, C_in, 3)
    b_conv = params["conv_b"]        # (C_out,)
    w_time = params["time_w"]        # (C_out, embed_dim)  (PyTorch Linear layout)
    b_time = params["time_b"]        # (C_out,)
    gamma = params["ln_gamma"]       # (C_out,)
    beta = params["ln_beta"]         # (C_out,)

    N, C_in, L = x.shape
    C_out = w_conv.shape[0]
    stride = 2 if downsample else 1
    L_out = (L + 2 - 3) // stride + 1

    # --- tiling / padding constants ---
    C_pad = _round_up(C_out, 128)            # lane-dense channel axis for compute
    C_out_p8 = _round_up(C_out, 8)           # sublane-aligned channel count stored
    TL = 512 if L_out >= 512 else (256 if L_out >= 256 else 128)
    L_out_pad = _round_up(L_out, TL)
    nLt = L_out_pad // TL
    n_groups = -(-3 // stride)               # ceil(3 / stride): 2 (stride=2), 3 (stride=1)
    W = stride * C_in                        # phase-major lane width

    # --- phase-major padded input (one relayout pass; no 3x im2col in HBM) ---
    # x_ph[n, m, p*C_in + c] = x_padded[n, m*stride + p, c], x_padded = zero-pad(1, ...)
    L_ph = _round_up(max(L_out_pad + 8, -(-(L + 2) // stride)), 8)
    P = L_ph * stride
    x_t = jnp.transpose(x, (0, 2, 1)).astype(jnp.float32)          # (N, L, C_in)
    x_t = jnp.pad(x_t, ((0, 0), (1, P - L - 1), (0, 0)))           # (N, P, C_in)
    x_ph = x_t.reshape(N, L_ph, W)

    # --- conv weights per row-offset group, zero-padded to C_pad lanes ---
    w_g = jnp.zeros((n_groups, W, C_pad), jnp.float32)
    for g in range(n_groups):
        for p in range(stride):
            k = g * stride + p
            if k < 3:
                w_g = w_g.at[g, p * C_in:(p + 1) * C_in, :C_out].set(
                    w_conv[:, :, k].T.astype(jnp.float32))

    pad_c = C_pad - C_out
    b_pad = jnp.pad(b_conv.astype(jnp.float32), (0, pad_c)).reshape(1, C_pad)
    gamma_pad = jnp.pad(gamma.astype(jnp.float32), (0, pad_c)).reshape(1, C_pad)

    # --- hoisted time projection (one batched XLA matmul), LN beta folded in ---
    shift = t_emb.astype(jnp.float32) @ w_time.T.astype(jnp.float32) + b_time + beta
    shift_pad = jnp.pad(shift, ((0, 0), (0, pad_c))).reshape(N, 1, C_pad)

    kernel = functools.partial(_convblock_kernel, TL=TL, C_out=C_out,
                               C_out_p8=C_out_p8, n_groups=n_groups)

    out = pl.pallas_call(
        kernel,
        out_shape=jax.ShapeDtypeStruct((N, C_out_p8, L_out_pad), jnp.float32),
        grid_spec=pltpu.PrefetchScalarGridSpec(
            num_scalar_prefetch=0,
            grid=(N, nLt),                                  # L-tile axis is innermost
            in_specs=[
                # full per-batch phase-major row; block index ignores t -> stays resident
                pl.BlockSpec((None, L_ph, W), lambda n, t: (n, 0, 0)),
                pl.BlockSpec((n_groups, W, C_pad), lambda n, t: (0, 0, 0)),
                pl.BlockSpec((1, C_pad), lambda n, t: (0, 0)),
                pl.BlockSpec((1, C_pad), lambda n, t: (0, 0)),
                pl.BlockSpec((None, 1, C_pad), lambda n, t: (n, 0, 0)),
            ],
            out_specs=pl.BlockSpec((None, C_out_p8, TL), lambda n, t: (n, 0, t)),
        ),
        compiler_params=pltpu.CompilerParams(
            dimension_semantics=("parallel", "parallel")),
    )(x_ph, w_g, b_pad, gamma_pad, shift_pad)

    # trim padding only (no transpose needed — kernel already wrote NCL)
    return out[:, :C_out, :L_out]


def conv_block_reference(x, t_emb, params, *, downsample=True):
    """Pure-JAX reference of ConvBlock.forward (use_attention=False)."""
    stride = (2,) if downsample else (1,)
    y = jax.lax.conv_general_dilated(
        x, params["conv_w"], window_strides=stride, padding=((1, 1),),
        dimension_numbers=("NCH", "OIH", "NCH"))
    y = y + params["conv_b"][None, :, None]
    y = jnp.transpose(y, (0, 2, 1))                              # (N, L_out, C_out)
    mean = jnp.mean(y, axis=-1, keepdims=True)
    var = jnp.mean((y - mean) ** 2, axis=-1, keepdims=True)
    y = (y - mean) * jax.lax.rsqrt(var + 1e-5)
    y = y * params["ln_gamma"] + params["ln_beta"]
    y = jnp.transpose(y, (0, 2, 1))                              # (N, C_out, L_out)
    t = t_emb @ params["time_w"].T + params["time_b"]            # (N, C_out)
    y = y + t[:, :, None]
    return y * jax.nn.sigmoid(y)


if __name__ == "__main__":
    # Small shapes consistent with ConvBlock(in_channels=4, out_channels=8, embed_dim=32)
    N, C_in, C_out, L, embed_dim = 2, 4, 8, 16, 32

    key = jax.random.PRNGKey(0)
    kx, kt, kw, kb, ktw, ktb = jax.random.split(key, 6)

    x = jax.random.normal(kx, (N, C_in, L), dtype=jnp.float32)
    t_emb = jax.random.normal(kt, (N, embed_dim), dtype=jnp.float32)

    params = {
        "conv_w": 0.1 * jax.random.normal(kw, (C_out, C_in, 3), dtype=jnp.float32),
        "conv_b": 0.1 * jax.random.normal(kb, (C_out,), dtype=jnp.float32),
        "time_w": 0.1 * jax.random.normal(ktw, (C_out, embed_dim), dtype=jnp.float32),
        "time_b": 0.1 * jax.random.normal(ktb, (C_out,), dtype=jnp.float32),
        "ln_gamma": jnp.ones((C_out,), dtype=jnp.float32),
        "ln_beta": jnp.zeros((C_out,), dtype=jnp.float32),
    }

    out = conv_block_forward(x, t_emb, params, downsample=True)
    out = jax.block_until_ready(out)

    ref = jax.block_until_ready(conv_block_reference(x, t_emb, params, downsample=True))
    assert out.shape == (N, C_out, (L + 2 - 3) // 2 + 1)
    assert jnp.allclose(out, ref, atol=1e-5, rtol=1e-5)

    print("KERNEL_OK")
</pallas_src>

<mosaic_0001>
module attributes {stable_mosaic.version = 11 : i64} {
  func.func @_convblock_kernel(%arg0: i32, %arg1: i32, %arg2: memref<1x136x8xf32, #tpu.memory_space<vmem>>, %arg3: memref<2x8x128xf32, #tpu.memory_space<vmem>>, %arg4: memref<1x128xf32, #tpu.memory_space<vmem>>, %arg5: memref<1x128xf32, #tpu.memory_space<vmem>>, %arg6: memref<1x1x128xf32, #tpu.memory_space<vmem>>, %arg7: memref<1x8x128xf32, #tpu.memory_space<vmem>>) attributes {dimension_semantics = [#tpu.dimension_semantics<parallel>, #tpu.dimension_semantics<parallel>], iteration_bounds = array<i64: 2, 1>, scalar_prefetch = 0 : i64, scratch_operands = 0 : i64, tpu.core_type = #tpu.core_type<tc>, window_params = [{transform_indices = @transform_0, window_bounds = array<i64: 1, 136, 8>}, {pipeline_mode = #tpu.pipeline_mode<synchronous>, transform_indices = @transform_1, window_bounds = array<i64: 2, 8, 128>}, {pipeline_mode = #tpu.pipeline_mode<synchronous>, transform_indices = @transform_2, window_bounds = array<i64: 1, 128>}, {pipeline_mode = #tpu.pipeline_mode<synchronous>, transform_indices = @transform_3, window_bounds = array<i64: 1, 128>}, {transform_indices = @transform_4, window_bounds = array<i64: 1, 1, 128>}, {transform_indices = @transform_5, window_bounds = array<i64: 1, 8, 128>}]} {
    %c128_i32 = arith.constant 128 : i32
    %0 = arith.muli %arg1, %c128_i32 : i32
    %1 = tpu.assume_multiple %0, 128 : i32
    %c0 = arith.constant 0 : index
    %2 = arith.index_cast %1 : i32 to index
    %c0_0 = arith.constant 0 : index
    %3 = vector.load %arg2[%c0, %2, %c0_0] : memref<1x136x8xf32, #tpu.memory_space<vmem>>, vector<1x136x8xf32>
    %4 = vector.shape_cast %3 : vector<1x136x8xf32> to vector<136x8xf32>
    %5 = vector.extract_strided_slice %4 {offsets = [0, 0], sizes = [128, 8], strides = [1, 1]} : vector<136x8xf32> to vector<128x8xf32>
    %c0_1 = arith.constant 0 : index
    %c0_2 = arith.constant 0 : index
    %c0_3 = arith.constant 0 : index
    %6 = vector.load %arg3[%c0_1, %c0_2, %c0_3] : memref<2x8x128xf32, #tpu.memory_space<vmem>>, vector<1x8x128xf32>
    %7 = vector.shape_cast %6 : vector<1x8x128xf32> to vector<8x128xf32>
    %cst = arith.constant dense<0.000000e+00> : vector<128x128xf32>
    %8 = tpu.matmul %5, %7, %cst {dimension_numbers = #tpu.dot_dimension_numbers<[1], [0], [0], [1], [0, 0, 1, 1], [], []>} : vector<128x8xf32>, vector<8x128xf32>, vector<128x128xf32> -> vector<128x128xf32>
    %9 = vector.extract_strided_slice %4 {offsets = [1, 0], sizes = [128, 8], strides = [1, 1]} : vector<136x8xf32> to vector<128x8xf32>
    %c1 = arith.constant 1 : index
    %c0_4 = arith.constant 0 : index
    %c0_5 = arith.constant 0 : index
    %10 = vector.load %arg3[%c1, %c0_4, %c0_5] : memref<2x8x128xf32, #tpu.memory_space<vmem>>, vector<1x8x128xf32>
    %11 = vector.shape_cast %10 : vector<1x8x128xf32> to vector<8x128xf32>
    %cst_6 = arith.constant dense<0.000000e+00> : vector<128x128xf32>
    %12 = tpu.matmul %9, %11, %cst_6 {dimension_numbers = #tpu.dot_dimension_numbers<[1], [0], [0], [1], [0, 0, 1, 1], [], []>} : vector<128x8xf32>, vector<8x128xf32>, vector<128x128xf32> -> vector<128x128xf32>
    %13 = arith.addf %8, %12 : vector<128x128xf32>
    %c0_7 = arith.constant 0 : index
    %c0_8 = arith.constant 0 : index
    %14 = vector.load %arg4[%c0_7, %c0_8] : memref<1x128xf32, #tpu.memory_space<vmem>>, vector<1x128xf32>
    %15 = vector.broadcast %14 : vector<1x128xf32> to vector<128x128xf32>
    %16 = arith.addf %13, %15 : vector<128x128xf32>
    %cst_9 = arith.constant dense<0.000000e+00> : vector<128xf32>
    %17 = vector.multi_reduction <add>, %16, %cst_9 [1] : vector<128x128xf32> to vector<128xf32>
    %18 = vector.shape_cast %17 : vector<128xf32> to vector<128x1xf32>
    %19 = arith.mulf %16, %16 : vector<128x128xf32>
    %cst_10 = arith.constant dense<0.000000e+00> : vector<128xf32>
    %20 = vector.multi_reduction <add>, %19, %cst_10 [1] : vector<128x128xf32> to vector<128xf32>
    %21 = vector.shape_cast %20 : vector<128xf32> to vector<128x1xf32>
    %cst_11 = arith.constant 1.250000e-01 : f32
    %22 = vector.broadcast %cst_11 : f32 to vector<128x1xf32>
    %23 = arith.mulf %18, %22 : vector<128x1xf32>
    %cst_12 = arith.constant 1.250000e-01 : f32
    %24 = vector.broadcast %cst_12 : f32 to vector<128x1xf32>
    %25 = arith.mulf %21, %24 : vector<128x1xf32>
    %26 = arith.mulf %23, %23 : vector<128x1xf32>
    %27 = arith.subf %25, %26 : vector<128x1xf32>
    %cst_13 = arith.constant 0.000000e+00 : f32
    %28 = vector.broadcast %cst_13 : f32 to vector<128x1xf32>
    %29 = arith.maximumf %27, %28 : vector<128x1xf32>
    %30 = vector.broadcast %23 : vector<128x1xf32> to vector<128x128xf32>
    %31 = arith.subf %16, %30 : vector<128x128xf32>
    %cst_14 = arith.constant 9.99999974E-6 : f32
    %32 = vector.broadcast %cst_14 : f32 to vector<128x1xf32>
    %33 = arith.addf %29, %32 : vector<128x1xf32>
    %34 = math.rsqrt %33 : vector<128x1xf32>
    %35 = vector.broadcast %34 : vector<128x1xf32> to vector<128x128xf32>
    %36 = arith.mulf %31, %35 : vector<128x128xf32>
    %c0_15 = arith.constant 0 : index
    %c0_16 = arith.constant 0 : index
    %37 = vector.load %arg5[%c0_15, %c0_16] : memref<1x128xf32, #tpu.memory_space<vmem>>, vector<1x128xf32>
    %38 = vector.broadcast %37 : vector<1x128xf32> to vector<128x128xf32>
    %39 = arith.mulf %36, %38 : vector<128x128xf32>
    %c0_17 = arith.constant 0 : index
    %c0_18 = arith.constant 0 : index
    %c0_19 = arith.constant 0 : index
    %40 = vector.load %arg6[%c0_17, %c0_18, %c0_19] : memref<1x1x128xf32, #tpu.memory_space<vmem>>, vector<1x1x128xf32>
    %41 = vector.shape_cast %40 : vector<1x1x128xf32> to vector<1x128xf32>
    %42 = vector.broadcast %41 : vector<1x128xf32> to vector<128x128xf32>
    %43 = arith.addf %39, %42 : vector<128x128xf32>
    %44 = arith.negf %43 : vector<128x128xf32>
    %45 = math.exp %44 : vector<128x128xf32>
    %cst_20 = arith.constant 1.000000e+00 : f32
    %46 = vector.broadcast %cst_20 : f32 to vector<128x128xf32>
    %47 = arith.addf %46, %45 : vector<128x128xf32>
    %48 = arith.divf %46, %47 : vector<128x128xf32>
    %49 = arith.mulf %43, %48 : vector<128x128xf32>
    %50 = tpu.transpose %49, [1, 0] : vector<128x128xf32> -> vector<128x128xf32>
    %51 = vector.extract_strided_slice %50 {offsets = [0, 0], sizes = [8, 128], strides = [1, 1]} : vector<128x128xf32> to vector<8x128xf32>
    %c0_21 = arith.constant 0 : index
    %c0_22 = arith.constant 0 : index
    %c0_23 = arith.constant 0 : index
    %52 = vector.load %arg7[%c0_21, %c0_22, %c0_23] : memref<1x8x128xf32, #tpu.memory_space<vmem>>, vector<1x8x128xf32>
    %53 = vector.shape_cast %52 : vector<1x8x128xf32> to vector<8x128xf32>
    %54 = vector.shape_cast %51 : vector<8x128xf32> to vector<1x8x128xf32>
    tpu.vector_store %arg7[%c0_21, %c0_22, %c0_23], %54 {strides = array<i32>} : memref<1x8x128xf32, #tpu.memory_space<vmem>>, vector<1x8x128xf32>,
    return
  }
  func.func @transform_0(%arg0: i32, %arg1: i32) -> (i32, i32, i32) {
    %c0_i32 = arith.constant 0 : i32
    %c0_i32_0 = arith.constant 0 : i32
    %c0_i32_1 = arith.constant 0 : i32
    return %arg0, %c0_i32, %c0_i32_0 : i32, i32, i32
  }
  func.func @transform_1(%arg0: i32, %arg1: i32) -> (i32, i32, i32) {
    %c0_i32 = arith.constant 0 : i32
    %c0_i32_0 = arith.constant 0 : i32
    %c0_i32_1 = arith.constant 0 : i32
    %c0_i32_2 = arith.constant 0 : i32
    return %c0_i32, %c0_i32_0, %c0_i32_1 : i32, i32, i32
  }
  func.func @transform_2(%arg0: i32, %arg1: i32) -> (i32, i32) {
    %c0_i32 = arith.constant 0 : i32
    %c0_i32_0 = arith.constant 0 : i32
    %c0_i32_1 = arith.constant 0 : i32
    return %c0_i32, %c0_i32_0 : i32, i32
  }
  func.func @transform_3(%arg0: i32, %arg1: i32) -> (i32, i32) {
    %c0_i32 = arith.constant 0 : i32
    %c0_i32_0 = arith.constant 0 : i32
    %c0_i32_1 = arith.constant 0 : i32
    return %c0_i32, %c0_i32_0 : i32, i32
  }
  func.func @transform_4(%arg0: i32, %arg1: i32) -> (i32, i32, i32) {
    %c0_i32 = arith.constant 0 : i32
    %c0_i32_0 = arith.constant 0 : i32
    %c0_i32_1 = arith.constant 0 : i32
    return %arg0, %c0_i32, %c0_i32_0 : i32, i32, i32
  }
  func.func @transform_5(%arg0: i32, %arg1: i32) -> (i32, i32, i32) {
    %c0_i32 = arith.constant 0 : i32
    %c0_i32_0 = arith.constant 0 : i32
    return %arg0, %c0_i32, %arg1 : i32, i32, i32
  }
}

</mosaic_0001>

<bundles_post_ra>
// kernel: tpu_custom_call.1
= control target key start
LH: loop header
LB: loop body
LE: loop exit
PB: predicated region body
PF: predicated region fallthrough
CT: control target
= control target key end

     0   :  { %10 = vsyncpa [#allocation3], 0  ;;  %s2093_s0 = inlined_call_operand.vmem [shape: f32[2,136,8], index: 0, kind: input, shape index: {}]   ;;  %s2094_s1 = inlined_call_operand.vmem [shape: f32[2,8,128], index: 1, kind: input, shape index: {}]   ;;  %s2095_s2 = inlined_call_operand.vmem [shape: f32[1,128], index: 2, kind: input, shape index: {}]   ;;  %s2096_s3 = inlined_call_operand.vmem [shape: f32[1,128], index: 3, kind: input, shape index: {}]   ;;  %s2097_s4 = inlined_call_operand.vmem [shape: f32[2,1,128], index: 4, kind: input, shape index: {}]   ;;  %s2098_s5 = inlined_call_operand.hbm [shape: f32[2,8,128], index: 5, kind: output, shape index: {}]  }
   0x1   :  { %12 = vsyncpa [#allocation3 + $0x1], 0  ;;  %s1621_s18 = smov 0   ;;  %s1623_s19 = smov 0  }
   0x2   :  { %s1625_s20 = smov 0   ;;  %s1627_s21 = smov 0  }
   0x3   :  { %s1629_s22 = smov 0   ;;  %s1631_s23 = smov 0  }
   0x4 LB: > { %s1211_s24 = sadd.s32 4294967295, %s1588_s23   ;;  %s1212_s25 = sadd.s32 4294967294, %s1588_s23   ;;  %s1588_s23 = sphi %s1631_s23, %s18_s23   ;;  %s1584_s22 = sphi %s1629_s22, %s2105_s22   ;;  %s1580_s21 = sphi %s1627_s21, %s2104_s21   ;;  %s1576_s20 = sphi %s1625_s20, %s2103_s20   ;;  %s1572_s19 = sphi %s1623_s19, %s2102_s19   ;;  %s1568_s18 = sphi %s1621_s18, %s2101_s18  }
   0x5   : > { %s30_s26 = sadd.s32 1, %s1584_s22  ;;  %s154_s27 = sadd.s32 1, %s1576_s20 }
   0x6   : > { %p32_p0 = scmp.ge.s32.totalorder %s30_s26, 2  ;;  %p164_p1 = scmp.ne.s32.totalorder %s1576_s20, %s1572_s19 }
   0x7   : > { %p165_p2 = scmp.eq.s32.totalorder %s1211_s24, 1  ;;  %p170_p3 = scmp.ne.s32.totalorder %s1572_s19, %s1568_s18 }
   0x8   : > { %s2107_s26 = smov (%p32_p0, %s30_s26), 0  ;;  %p171_p5 = scmp.eq.s32.totalorder %s1212_s25, 1 }
   0x9   : > { %p1661_p4 = por %p165_p2, %p164_p1  ;;  %s149_s29 = ssub.s32 %s1584_s22, %s2107_s26 }
   0xa   : > { %p1215_p6 = scmp.ge.s32.totalorder %s1588_s23, 1  ;;  %p152_p7 = scmp.eq.s32.totalorder %s149_s29, 0 }
   0xb   : > { %p1668_p8 = por %p171_p5, %p170_p3  ;;  %p212_p9 = scmp.lt.s32.totalorder %s1588_s23, 3 }
   0xc   : > { %s1674_s6 = scalar_select %p152_p7, %s1576_s20, %s154_s27  }
   0xd   : > { %p213_p10 = pnand %p1215_p6, %p212_p9 }
   0xe   : > { %p243_p11 = scmp.lt.s32.totalorder (!%p213_p10), %s1580_s21, 1  ;;  %s240_s8 = sand.u32 (!%p213_p10), 1, %s1572_s19  }
   0xf   : > { %216 = sbr.rel (%p213_p10) target bundleno = 577 (0x241), region = 40  ;;  %s1216_s9 = sshll.u32 (!%p213_p10), %s240_s8, 3 }
  0x10   : > { %s242_s10 = scalar_lea.vmem (!%p213_p10), [#allocation2], %s1216_s9  ;;  %s1118_s16 = scalar_lea.sflag (!%p213_p10), [#allocation3], %s240_s8 }
  0x11   : > { %s1590_s24 = smov (!%p213_p10), [#allocation2]  }
  0x12   : > { %s1516_s25 = sshll.u32 (!%p213_p10), %s1590_s24, 4  ;;  %s1517_s25 = int_to_ptr.vmem [resolvable:$false] %s1516_s25 }
  0x14   : > { %v270_v0 = vld [vmem:[%s2094_s1] sm:$0xff]  ;;  %v1218_v1 = vld [vmem:[%s2094_s1 + $0x8] sm:$0xff]  ;;  %s1684_s11 = scalar_select %p243_p11, %s1580_s21, 1  ;;  %vm324_vm0 = vcmask 64512   ;;  %vm290_vm1 = vcmask 1046528  }
  0x15   : > { %1334 = vmatprep.subr.mxu1 %v270_v0  ;;  %1308 = vmatprep.subr.mxu0 %v1218_v1  ;;  %v1760_v54 = vld [vmem:[%s2095_s2] ss:$0 sm:$0xff] }
  0x16   : > { %1335 = vmatpush3.msra.mxu1 %v270_v0  ;;  %1309 = vmatpush3.msra.mxu0 %v1218_v1  ;;  %s1360_s12 = smul.u32 136, %s1684_s11  ;;  %s250_s27 = scalar_lea.vmem %s2097_s4, %s1684_s11 }
  0x17   : > { %s1132_s11 = sshll.u32 %s242_s10, 4  ;;  %s2050_s11 = int_to_ptr.vmem [resolvable:$true] %s1132_s11 }
  0x18   : > { %s1690_s15 = scalar_lea.vmem %s2093_s0, %s1360_s12  ;;  %s1271_s12 = sshll.u32 %s1580_s21, 7 }
  0x19   : > { %v253_v2 = vld [vmem:[%s1690_s15] sm:$0xff]  ;;  %v254_v3 = vld [vmem:[%s1690_s15 + $0x8] sm:$0xff]  ;;  %v255_v4 = vld [vmem:[%s1690_s15 + $0x10] sm:$0xff]  ;;  %s1512_s17 = scalar_lea.vmem %s2050_s11, 128  ;;  %s1518_s21 = scalar_lea.vmem %s1517_s25, 256 }
  0x1a   : > { %v291_v5 = vrot.slane %v253_v2, 1  ;;  %1336 = vmatprep.mubr.msk.f32.mxu1 %vm324_vm0, %v253_v2  ;;  %v292_v6 = vrot.slane %v254_v3, 1  ;;  %v294_v7 = vrot.slane %v255_v4, 1  ;;  %v256_v8 = vld [vmem:[%s1690_s15 + $0x18] sm:$0xff]  ;;  %v257_v9 = vld [vmem:[%s1690_s15 + $0x20] sm:$0xff]  ;;  %v258_v10 = vld [vmem:[%s1690_s15 + $0x28] sm:$0xff]  ;;  %p1513_p12 = scmp.ne.s32.totalorder %s2050_s11, %s1512_s17  ;;  %p1519_p1 = scmp.lt.s32.totalorder %s2050_s11, %s1517_s25 }
  0x1b   : > { %1337 = vmatmul.mubr.msk.f32.vlgmr.msra.gmra.mxu1 %vm324_vm0, %v254_v3  ;;  %v296_v11 = vrot.slane %v256_v8, 1  ;;  %v298_v12 = vrot.slane %v257_v9, 1  ;;  %v300_v15 = vrot.slane %v258_v10, 1  ;;  %v259_v16 = vld [vmem:[%s1690_s15 + $0x30] sm:$0xff]  ;;  %v260_v18 = vld [vmem:[%s1690_s15 + $0x38] sm:$0xff]  ;;  %v261_v23 = vld [vmem:[%s1690_s15 + $0x40] sm:$0xff]  ;;  %p1520_p2 = scmp.lt.s32.totalorder %s1518_s21, %s1512_s17 }
  0x1c   : > { %v293_v13 = vsel %vm290_vm1, %v291_v5, %v292_v6  ;;  %v295_v14 = vsel %vm290_vm1, %v292_v6, %v294_v7  ;;  %1339 = vmatprep.mubr.msk.f32.mxu1 %vm324_vm0, %v255_v4  ;;  %v302_v20 = vrot.slane %v259_v16, 1  ;;  %v304_v22 = vrot.slane %v260_v18, 1  ;;  %v262_v24 = vld [vmem:[%s1690_s15 + $0x48] sm:$0xff]  ;;  %v263_v29 = vld [vmem:[%s1690_s15 + $0x50] sm:$0xff]  ;;  %v264_v30 = vld [vmem:[%s1690_s15 + $0x58] sm:$0xff]  ;;  %p1514_p13 = pnand %p1513_p12, %p1661_p4 }
  0x1d   : > { %1310 = vmatprep.mubr.msk.f32.mxu0 %vm324_vm0, %v293_v13  ;;  %v297_v17 = vsel %vm290_vm1, %v294_v7, %v296_v11  ;;  %v299_v19 = vsel %vm290_vm1, %v296_v11, %v298_v12  ;;  %v301_v21 = vsel %vm290_vm1, %v298_v12, %v300_v15  ;;  %v306_v26 = vrot.slane %v261_v23, 1  ;;  %v265_v35 = vld [vmem:[%s1690_s15 + $0x60] sm:$0xff]  ;;  %v266_v36 = vld [vmem:[%s1690_s15 + $0x68] sm:$0xff]  ;;  %v267_v41 = vld [vmem:[%s1690_s15 + $0x70] sm:$0xff]  ;;  %p1521_p3 = por %p1520_p2, %p1519_p1 }
  0x1e   : > { %1311 = vmatmul.mubr.msk.f32.vlgmr.msra.gmra.mxu0 %vm324_vm0, %v295_v14  ;;  %v303_v25 = vsel %vm290_vm1, %v300_v15, %v302_v20  ;;  %v305_v27 = vsel %vm290_vm1, %v302_v20, %v304_v22  ;;  %v308_v28 = vrot.slane %v262_v24, 1  ;;  %v310_v32 = vrot.slane %v263_v29, 1  ;;  %v268_v42 = vld [vmem:[%s1690_s15 + $0x78] sm:$0xff]  ;;  %v269_v47 = vld [vmem:[%s1690_s15 + $0x80] sm:$0xff]  ;;  %s1130_s15 = scalar_lea.hbm %s2098_s5, %s1271_s12  ;;  %p1515_p0 = pneg %p1514_p13 }
  0x1f   : > { %1313 = vmatprep.mubr.msk.f32.mxu0 %vm324_vm0, %v297_v17  ;;  %1340 = vmatmul.mubr.msk.f32.gmra.mxu1 %vm324_vm0, %v256_v8  ;;  %v307_v31 = vsel %vm290_vm1, %v304_v22, %v306_v26  ;;  %v312_v34 = vrot.slane %v264_v30, 1  ;;  %v314_v38 = vrot.slane %v265_v35, 1  ;;  %v316_v40 = vrot.slane %v266_v36, 1 }
  0x20   : > { %1342 = vmatprep.mubr.msk.f32.mxu1 %vm324_vm0, %v257_v9  ;;  %v309_v33 = vsel %vm290_vm1, %v306_v26, %v308_v28  ;;  %v311_v37 = vsel %vm290_vm1, %v308_v28, %v310_v32  ;;  %v318_v44 = vrot.slane %v267_v41, 1  ;;  %v320_v46 = vrot.slane %v268_v42, 1  ;;  %p1522_p5 = pnand %p1521_p3, %p1515_p0 }
  0x21   : > { %v313_v39 = vsel %vm290_vm1, %v310_v32, %v312_v34  ;;  %v315_v43 = vsel %vm290_vm1, %v312_v34, %v314_v38  ;;  %v317_v45 = vsel %vm290_vm1, %v314_v38, %v316_v40  ;;  %v322_v49 = vrot.slane %v269_v47, 1 }
  0x22   : > { %1314 = vmatmul.mubr.msk.f32.gmra.mxu0 %vm324_vm0, %v299_v19  ;;  %v319_v48 = vsel %vm290_vm1, %v316_v40, %v318_v44  ;;  %v321_v50 = vsel %vm290_vm1, %v318_v44, %v320_v46 }
  0x23   : > { %1316 = vmatprep.mubr.msk.f32.mxu0 %vm324_vm0, %v301_v21  ;;  %1343 = vmatmul.mubr.msk.f32.gmra.mxu1 %vm324_vm0, %v258_v10  ;;  %v323_v51 = vsel %vm290_vm1, %v320_v46, %v322_v49 }
  0x24   : > { %1345 = vmatprep.mubr.msk.f32.mxu1 %vm324_vm0, %v259_v16 }
  0x26   : > { %1317 = vmatmul.mubr.msk.f32.gmra.mxu0 %vm324_vm0, %v303_v25 }
  0x27   : > { %1319 = vmatprep.mubr.msk.f32.mxu0 %vm324_vm0, %v305_v27  ;;  %1346 = vmatmul.mubr.msk.f32.gmra.mxu1 %vm324_vm0, %v260_v18 }
  0x28   : > { %1348 = vmatprep.mubr.msk.f32.mxu1 %vm324_vm0, %v261_v23 }
  0x2a   : > { %1320 = vmatmul.mubr.msk.f32.gmra.mxu0 %vm324_vm0, %v307_v31 }
  0x2b   : > { %1322 = vmatprep.mubr.msk.f32.mxu0 %vm324_vm0, %v309_v33  ;;  %1349 = vmatmul.mubr.msk.f32.gmra.mxu1 %vm324_vm0, %v262_v24 }
  0x2c   : > { %1351 = vmatprep.mubr.msk.f32.mxu1 %vm324_vm0, %v263_v29 }
  0x2e   : > { %1323 = vmatmul.mubr.msk.f32.gmra.mxu0 %vm324_vm0, %v311_v37 }
  0x2f   : > { %1325 = vmatprep.mubr.msk.f32.mxu0 %vm324_vm0, %v313_v39  ;;  %1352 = vmatmul.mubr.msk.f32.gmra.mxu1 %vm324_vm0, %v264_v30 }
  0x30   : > { %1354 = vmatprep.mubr.msk.f32.mxu1 %vm324_vm0, %v265_v35 }
  0x32   : > { %1326 = vmatmul.mubr.msk.f32.gmra.mxu0 %vm324_vm0, %v315_v43 }
  0x33   : > { %1328 = vmatprep.mubr.msk.f32.mxu0 %vm324_vm0, %v317_v45  ;;  %1355 = vmatmul.mubr.msk.f32.gmra.mxu1 %vm324_vm0, %v266_v36 }
  0x34   : > { %1357 = vmatprep.mubr.msk.f32.mxu1 %vm324_vm0, %v267_v41 }
  0x36   : > { %1329 = vmatmul.mubr.msk.f32.gmra.mxu0 %vm324_vm0, %v319_v48 }
  0x37   : > { %1331 = vmatprep.mubr.msk.f32.mxu0 %vm324_vm0, %v321_v50  ;;  %1358 = vmatmul.mubr.msk.f32.gmra.mxu1 %vm324_vm0, %v268_v42 }
  0x3a   : > { %1332 = vmatmul.mubr.msk.f32.gmra.mxu0 %vm324_vm0, %v323_v51 }
  0xdb   : > { %v1338_v52 = vpop.f32.mrf.mxu1 }
  0xdd   : > { %v600_v55 = vpop.f32.mrf.mxu1 }
  0xde   : > { %v1312_v53 = vpop.f32.mrf.mxu0 }
  0xdf   : > { %v606_v56 = vadd.f32 %v1338_v52, %v1312_v53  ;;  %v1341_v58 = vpop.f32.mrf.mxu1 }
  0xe0   : > { %v423_v57 = vpop.f32.mrf.mxu0 }
  0xe1   : > { %v1763_v59 = vadd.f32 %v1760_v54, %v606_v56  ;;  %v601_v60 = vadd.f32 %v600_v55, %v423_v57  ;;  %v610_v2 = vpop.f32.mrf.mxu1 }
  0xe2   : > { %v1315_v61 = vpop.f32.mrf.mxu0 }
  0xe3   : > { %v1766_v62 = vadd.f32 %v1760_v54, %v601_v60  ;;  %704 = vadd.xlane.f32.xlu0 %v1763_v59  ;;  %v616_v63 = vadd.f32 %v1341_v58, %v1315_v61  ;;  %v1344_v5 = vpop.f32.mrf.mxu1  ;;  %v735_v7 = vmul.f32 %v1763_v59, %v1763_v59 }
  0xe4   : > { %v433_v1 = vpop.f32.mrf.mxu0 }
  0xe5   : > { %v734_v0 = vmul.f32 %v1766_v62, %v1766_v62  ;;  %v1772_v3 = vadd.f32 %v1760_v54, %v616_v63  ;;  %v611_v6 = vadd.f32 %v610_v2, %v433_v1  ;;  %v620_v12 = vpop.f32.mrf.mxu1 }
  0xe6   : > { %v1318_v4 = vpop.f32.mrf.mxu0 }
  0xe7   : > { %702 = vadd.xlane.f32.xlu0 %v1766_v62  ;;  %750 = vadd.xlane.f32.xlu1 %v734_v0  ;;  %v626_v8 = vadd.f32 %v1344_v5, %v1318_v4  ;;  %v737_v9 = vmul.f32 %v1772_v3, %v1772_v3  ;;  %v1781_v10 = vadd.f32 %v1760_v54, %v611_v6  ;;  %v1347_v15 = vpop.f32.mrf.mxu1 }
  0xe8   : > { %v443_v11 = vpop.f32.mrf.mxu0 }
  0xe9   : > { %v1784_v13 = vadd.f32 %v1760_v54, %v626_v8  ;;  %v621_v16 = vadd.f32 %v620_v12, %v443_v11  ;;  %v736_v17 = vmul.f32 %v1781_v10, %v1781_v10  ;;  %v630_v22 = vpop.f32.mrf.mxu1 }
  0xea   : > { %v1321_v14 = vpop.f32.mrf.mxu0 }
  0xeb   : > { %752 = vadd.xlane.f32.xlu0 %v735_v7  ;;  %708 = vadd.xlane.f32.xlu1 %v1772_v3  ;;  %v636_v18 = vadd.f32 %v1347_v15, %v1321_v14  ;;  %v739_v19 = vmul.f32 %v1784_v13, %v1784_v13  ;;  %v1793_v20 = vadd.f32 %v1760_v54, %v621_v16  ;;  %v1350_v25 = vpop.f32.mrf.mxu1 }
  0xec   : > { %v453_v21 = vpop.f32.mrf.mxu0 }
  0xed   : > { %v1796_v23 = vadd.f32 %v1760_v54, %v636_v18  ;;  %v631_v26 = vadd.f32 %v630_v22, %v453_v21  ;;  %v738_v27 = vmul.f32 %v1793_v20, %v1793_v20  ;;  %v640_v32 = vpop.f32.mrf.mxu1 }
  0xee   : > { %v1324_v24 = vpop.f32.mrf.mxu0 }
  0xef   : > { %756 = vadd.xlane.f32.xlu0 %v737_v9  ;;  %706 = vadd.xlane.f32.xlu1 %v1781_v10  ;;  %v646_v28 = vadd.f32 %v1350_v25, %v1324_v24  ;;  %v741_v29 = vmul.f32 %v1796_v23, %v1796_v23  ;;  %v1805_v30 = vadd.f32 %v1760_v54, %v631_v26  ;;  %v1353_v35 = vpop.f32.mrf.mxu1 }
  0xf0   : > { %v463_v31 = vpop.f32.mrf.mxu0 }
  0xf1   : > { %v1808_v33 = vadd.f32 %v1760_v54, %v646_v28  ;;  %v641_v36 = vadd.f32 %v640_v32, %v463_v31  ;;  %v740_v37 = vmul.f32 %v1805_v30, %v1805_v30  ;;  %v650_v41 = vpop.f32.mrf.mxu1 }
  0xf2   : > { %v1327_v34 = vpop.f32.mrf.mxu0 }
  0xf3   : > { %754 = vadd.xlane.f32.xlu0 %v736_v17  ;;  %712 = vadd.xlane.f32.xlu1 %v1784_v13  ;;  %v656_v38 = vadd.f32 %v1353_v35, %v1327_v34  ;;  %v743_v39 = vmul.f32 %v1808_v33, %v1808_v33  ;;  %v1817_v42 = vadd.f32 %v1760_v54, %v641_v36  ;;  %v1356_v44 = vpop.f32.mrf.mxu1 }
  0xf4   : > { %v473_v40 = vpop.f32.mrf.mxu0 }
  0xf5   : > { %v1820_v45 = vadd.f32 %v1760_v54, %v656_v38  ;;  %v651_v46 = vadd.f32 %v650_v41, %v473_v40  ;;  %v742_v47 = vmul.f32 %v1817_v42, %v1817_v42  ;;  %v660_v49 = vpop.f32.mrf.mxu1 }
  0xf6   : > { %v1330_v43 = vpop.f32.mrf.mxu0 }
  0xf7   : > { %760 = vadd.xlane.f32.xlu0 %v739_v19  ;;  %710 = vadd.xlane.f32.xlu1 %v1793_v20  ;;  %v666_v50 = vadd.f32 %v1356_v44, %v1330_v43  ;;  %v745_v51 = vmul.f32 %v1820_v45, %v1820_v45  ;;  %v1359_v53 = vpop.f32.mrf.mxu1  ;;  %v1829_v55 = vadd.f32 %v1760_v54, %v651_v46 }
  0xf8   : > { %v483_v48 = vpop.f32.mrf.mxu0 }
  0xf9   : > { %v1832_v56 = vadd.f32 %v1760_v54, %v666_v50  ;;  %v670_v58 = vpop.f32.mrf.mxu1  ;;  %v661_v60 = vadd.f32 %v660_v49, %v483_v48  ;;  %v744_v61 = vmul.f32 %v1829_v55, %v1829_v55 }
  0xfa   : > { %v1333_v52 = vpop.f32.mrf.mxu0 }
  0xfb   : > { %758 = vadd.xlane.f32.xlu0 %v738_v27  ;;  %716 = vadd.xlane.f32.xlu1 %v1796_v23  ;;  %v676_v63 = vadd.f32 %v1359_v53, %v1333_v52  ;;  %v747_v0 = vmul.f32 %v1832_v56, %v1832_v56  ;;  %v1841_v2 = vadd.f32 %v1760_v54, %v661_v60 }
  0xfc   : > { %v493_v57 = vpop.f32.mrf.mxu0 }
  0xfd   : > { %v671_v1 = vadd.f32 %v670_v58, %v493_v57  ;;  %v1844_v4 = vadd.f32 %v1760_v54, %v676_v63  ;;  %v746_v6 = vmul.f32 %v1841_v2, %v1841_v2 }
  0xff   : > { %764 = vadd.xlane.f32.xlu0 %v741_v29  ;;  %714 = vadd.xlane.f32.xlu1 %v1805_v30  ;;  %v1848_v5 = vadd.f32 %v1760_v54, %v671_v1  ;;  %v749_v8 = vmul.f32 %v1844_v4, %v1844_v4 }
 0x101   : > { %v748_v7 = vmul.f32 %v1848_v5, %v1848_v5 }
 0x103   : > { %762 = vadd.xlane.f32.xlu0 %v740_v37  ;;  %720 = vadd.xlane.f32.xlu1 %v1808_v33 }
 0x107   : > { %768 = vadd.xlane.f32.xlu0 %v743_v39  ;;  %718 = vadd.xlane.f32.xlu1 %v1817_v42 }
 0x10b   : > { %766 = vadd.xlane.f32.xlu0 %v742_v47  ;;  %724 = vadd.xlane.f32.xlu1 %v1820_v45 }
 0x10f   : > { %772 = vadd.xlane.f32.xlu0 %v745_v51  ;;  %722 = vadd.xlane.f32.xlu1 %v1829_v55 }
 0x113   : > { %770 = vadd.xlane.f32.xlu0 %v744_v61  ;;  %728 = vadd.xlane.f32.xlu1 %v1832_v56 }
 0x117   : > { %776 = vadd.xlane.f32.xlu0 %v747_v0  ;;  %726 = vadd.xlane.f32.xlu1 %v1841_v2 }
 0x11b   : > { %774 = vadd.xlane.f32.xlu0 %v746_v6  ;;  %732 = vadd.xlane.f32.xlu1 %v1844_v4 }
 0x11f   : > { %730 = vadd.xlane.f32.xlu1 %v1848_v5  ;;  %778 = vadd.xlane.f32.xlu0 %v748_v7 }
 0x123   : > { %780 = vadd.xlane.f32.xlu1 %v749_v8 }
 0x16c   : > { %v705_v9 = vpop.xlane.xlu0 %704 }
 0x16d   : > { %v1858_v12 = vmul.f32 0.125, %v705_v9 }
 0x16f   : > { %v815_v19 = vmul.f32 %v1858_v12, %v1858_v12 }
 0x170   : > { %v703_v11 = vpop.xlane.xlu0 %702  ;;  %v751_v54 = vpop.xlane.xlu1 %750 }
 0x171   : > { %v782_v14 = vmul.f32 0.125, %v703_v11  ;;  %v798_v16 = vmul.f32 0.125, %v751_v54 }
 0x173   : > { %v814_v15 = vmul.f32 %v782_v14, %v782_v14  ;;  %v862_v54 = vsub.f32 %v1766_v62, %v782_v14  ;;  %v863_v62 = vsub.f32 %v1763_v59, %v1858_v12 }
 0x174   : > { %v753_v17 = vpop.xlane.xlu0 %752  ;;  %v709_v18 = vpop.xlane.xlu1 %708 }
 0x175   : > { %v830_v21 = vsub.f32 %v798_v16, %v814_v15  ;;  %v799_v22 = vmul.f32 0.125, %v753_v17  ;;  %v1862_v24 = vmul.f32 0.125, %v709_v18 }
 0x177   : > { %v846_v25 = vmax.f32 %v830_v21, 0.0  ;;  %v831_v26 = vsub.f32 %v799_v22, %v815_v19  ;;  %v817_v27 = vmul.f32 %v1862_v24, %v1862_v24  ;;  %v1892_v21 = vld [vmem:[%s2096_s3] ss:$0 sm:$0xff]  ;;  %v865_v59 = vsub.f32 %v1772_v3, %v1862_v24 }
 0x178   : > { %v757_v28 = vpop.xlane.xlu0 %756  ;;  %v707_v29 = vpop.xlane.xlu1 %706 }
 0x179   : > { %v878_v31 = vadd.f32 1e-05, %v846_v25  ;;  %v847_v32 = vmax.f32 %v831_v26, 0.0  ;;  %v801_v34 = vmul.f32 0.125, %v757_v28  ;;  %v1866_v35 = vmul.f32 0.125, %v707_v29 }
 0x17b   : > { %1416 = vrsqrt.f32 %v878_v31  ;;  %v879_v36 = vadd.f32 1e-05, %v847_v32  ;;  %v833_v37 = vsub.f32 %v801_v34, %v817_v27  ;;  %v816_v38 = vmul.f32 %v1866_v35, %v1866_v35  ;;  %v1896_v27 = vld [vmem:[%s250_s27] ss:$0 sm:$0xff] }
 0x17c   : > { %v755_v39 = vpop.xlane.xlu0 %754  ;;  %v713_v40 = vpop.xlane.xlu1 %712 }
 0x17d   : > { %1418 = vrsqrt.f32 %v879_v36  ;;  %v849_v41 = vmax.f32 %v833_v37, 0.0  ;;  %v800_v43 = vmul.f32 0.125, %v755_v39  ;;  %v1870_v44 = vmul.f32 0.125, %v713_v40 }
 0x17f   : > { %v881_v46 = vadd.f32 1e-05, %v849_v41  ;;  %v832_v47 = vsub.f32 %v800_v43, %v816_v38  ;;  %v819_v48 = vmul.f32 %v1870_v44, %v1870_v44 }
 0x180   : > { %v761_v49 = vpop.xlane.xlu0 %760  ;;  %v711_v50 = vpop.xlane.xlu1 %710 }
 0x181   : > { %1420 = vrsqrt.f32 %v881_v46  ;;  %v848_v51 = vmax.f32 %v832_v47, 0.0  ;;  %v803_v52 = vmul.f32 0.125, %v761_v49  ;;  %v1874_v53 = vmul.f32 0.125, %v711_v50 }
 0x183   : > { %v880_v57 = vadd.f32 1e-05, %v848_v51  ;;  %v835_v58 = vsub.f32 %v803_v52, %v819_v48  ;;  %v818_v60 = vmul.f32 %v1874_v53, %v1874_v53 }
 0x184   : > { %v759_v61 = vpop.xlane.xlu0 %758  ;;  %v717_v63 = vpop.xlane.xlu1 %716 }
 0x185   : > { %1422 = vrsqrt.f32 %v880_v57  ;;  %v851_v0 = vmax.f32 %v835_v58, 0.0  ;;  %v802_v1 = vmul.f32 0.125, %v759_v61  ;;  %v1878_v6 = vmul.f32 0.125, %v717_v63 }
 0x186   : > { %v864_v58 = vsub.f32 %v1781_v10, %v1866_v35 }
 0x187   : > { %v883_v7 = vadd.f32 1e-05, %v851_v0  ;;  %v834_v8 = vsub.f32 %v802_v1, %v818_v60  ;;  %v821_v9 = vmul.f32 %v1878_v6, %v1878_v6 }
 0x188   : > { %v1417_v11 = vpop.eup %1416  ;;  %v765_v15 = vpop.xlane.xlu0 %764 }
 0x189   : > { %v715_v16 = vpop.xlane.xlu1 %714  ;;  %1424 = vrsqrt.f32 %v883_v7  ;;  %v850_v17 = vmax.f32 %v834_v8, 0.0  ;;  %v805_v18 = vmul.f32 0.125, %v765_v15  ;;  %v910_v14 = vmul.f32 %v1417_v11, %v862_v54 }
 0x18a   : > { %v1887_v19 = vmul.f32 0.125, %v715_v16  ;;  %v1419_v22 = vpop.eup %1418  ;;  %v867_v16 = vsub.f32 %v1784_v13, %v1870_v44 }
 0x18b   : > { %v882_v25 = vadd.f32 1e-05, %v850_v17  ;;  %v837_v26 = vsub.f32 %v805_v18, %v821_v9  ;;  %v933_v32 = vmul.f32 %v1892_v21, %v910_v14  ;;  %v911_v34 = vmul.f32 %v1419_v22, %v863_v62 }
 0x18c   : > { %v820_v28 = vmul.f32 %v1887_v19, %v1887_v19  ;;  %v763_v29 = vpop.xlane.xlu0 %762 }
 0x18d   : > { %v721_v31 = vpop.xlane.xlu1 %720  ;;  %1426 = vrsqrt.f32 %v882_v25  ;;  %v853_v36 = vmax.f32 %v837_v26, 0.0  ;;  %v804_v37 = vmul.f32 0.125, %v763_v29  ;;  %v1906_v12 = vadd.f32 %v1896_v27, %v933_v32 }
 0x18e   : > { %v1901_v38 = vmul.f32 0.125, %v721_v31  ;;  %v1421_v39 = vpop.eup %1420  ;;  %v934_v40 = vmul.f32 %v1892_v21, %v911_v34  ;;  %v866_v34 = vsub.f32 %v1793_v20, %v1874_v53 }
 0x18f   : > { %v885_v41 = vadd.f32 1e-05, %v853_v36  ;;  %v836_v43 = vsub.f32 %v804_v37, %v820_v28  ;;  %v1254_v49 = vmul.f32 -1.442695, %v1906_v12  ;;  %v913_v51 = vmul.f32 %v1421_v39, %v865_v59 }
 0x190   : > { %v823_v46 = vmul.f32 %v1901_v38, %v1901_v38  ;;  %v769_v47 = vpop.xlane.xlu0 %768  ;;  %v1913_v50 = vadd.f32 %v1896_v27, %v934_v40 }
 0x191   : > { %v719_v48 = vpop.xlane.xlu1 %718  ;;  %1428 = vrsqrt.f32 %v885_v41  ;;  %v852_v3 = vmax.f32 %v836_v43, 0.0  ;;  %v807_v24 = vmul.f32 0.125, %v769_v47  ;;  %v936_v61 = vmul.f32 %v1892_v21, %v913_v51 }
 0x192   : > { %v1915_v52 = vmul.f32 0.125, %v719_v48  ;;  %v1423_v57 = vpop.eup %1422  ;;  %1430 = vpow2.f32 %v1254_v49  ;;  %v1255_v60 = vmul.f32 -1.442695, %v1913_v50  ;;  %v869_v51 = vsub.f32 %v1796_v23, %v1878_v6 }
 0x193   : > { %v884_v63 = vadd.f32 1e-05, %v852_v3  ;;  %v839_v0 = vsub.f32 %v807_v24, %v823_v46  ;;  %v912_v9 = vmul.f32 %v1423_v57, %v864_v58  ;;  %v1924_v11 = vadd.f32 %v1896_v27, %v936_v61 }
 0x194   : > { %v822_v1 = vmul.f32 %v1915_v52, %v1915_v52  ;;  %v767_v7 = vpop.xlane.xlu0 %766  ;;  %1432 = vpow2.f32 %v1255_v60 }
 0x195   : > { %v725_v8 = vpop.xlane.xlu1 %724  ;;  %1434 = vrsqrt.f32 %v884_v63  ;;  %v855_v54 = vmax.f32 %v839_v0, 0.0  ;;  %v806_v10 = vmul.f32 0.125, %v767_v7  ;;  %v935_v17 = vmul.f32 %v1892_v21, %v912_v9 }
 0x196   : > { %v1926_v35 = vmul.f32 0.125, %v725_v8  ;;  %v1425_v15 = vpop.eup %1424  ;;  %v1257_v18 = vmul.f32 -1.442695, %v1924_v11  ;;  %v868_v63 = vsub.f32 %v1805_v30, %v1887_v19 }
 0x197   : > { %v887_v22 = vadd.f32 1e-05, %v855_v54  ;;  %v838_v62 = vsub.f32 %v806_v10, %v822_v1  ;;  %v1935_v28 = vadd.f32 %v1896_v27, %v935_v17  ;;  %v915_v29 = vmul.f32 %v1425_v15, %v867_v16 }
 0x198   : > { %v825_v14 = vmul.f32 %v1926_v35, %v1926_v35  ;;  %v773_v25 = vpop.xlane.xlu0 %772  ;;  %1436 = vpow2.f32 %v1257_v18 }
 0x199   : > { %v723_v26 = vpop.xlane.xlu1 %722  ;;  %1438 = vrsqrt.f32 %v887_v22  ;;  %v854_v31 = vmax.f32 %v838_v62, 0.0  ;;  %v809_v32 = vmul.f32 0.125, %v773_v25  ;;  %v1256_v36 = vmul.f32 -1.442695, %v1935_v28 }
 0x19a   : > { %v1937_v13 = vmul.f32 0.125, %v723_v26  ;;  %v1427_v44 = vpop.eup %1426  ;;  %v938_v37 = vmul.f32 %v1892_v21, %v915_v29 }
 0x19b   : > { %v886_v39 = vadd.f32 1e-05, %v854_v31  ;;  %v841_v59 = vsub.f32 %v809_v32, %v825_v14  ;;  %1440 = vpow2.f32 %v1256_v36  ;;  %v914_v46 = vmul.f32 %v1427_v44, %v866_v34 }
 0x19c   : > { %v824_v40 = vmul.f32 %v1937_v13, %v1937_v13  ;;  %v771_v41 = vpop.xlane.xlu0 %770  ;;  %v1946_v47 = vadd.f32 %v1896_v27, %v938_v37  ;;  %v871_v34 = vsub.f32 %v1808_v33, %v1901_v38 }
 0x19d   : > { %v729_v43 = vpop.xlane.xlu1 %728  ;;  %1442 = vrsqrt.f32 %v886_v39  ;;  %v857_v48 = vmax.f32 %v841_v59, 0.0  ;;  %v808_v49 = vmul.f32 0.125, %v771_v41  ;;  %v937_v3 = vmul.f32 %v1892_v21, %v914_v46 }
 0x19e   : > { %v1948_v20 = vmul.f32 0.125, %v729_v43  ;;  %v1429_v53 = vpop.eup %1428  ;;  %v1259_v61 = vmul.f32 -1.442695, %v1946_v47  ;;  %v870_v41 = vsub.f32 %v1817_v42, %v1915_v52 }
 0x19f   : > { %v1431_v24 = vpop.eup %1430  ;;  %v889_v57 = vadd.f32 1e-05, %v857_v48  ;;  %v840_v58 = vsub.f32 %v808_v49, %v824_v40  ;;  %v1959_v8 = vadd.f32 %v1896_v27, %v937_v3  ;;  %v917_v23 = vmul.f32 %v1429_v53, %v869_v51 }
 0x1a0   : > { %v827_v60 = vmul.f32 %v1948_v20, %v1948_v20  ;;  %v777_v0 = vpop.xlane.xlu0 %776  ;;  %v1020_v7 = vadd.f32 1.0, %v1431_v24 }
 0x1a1   : > { %v727_v1 = vpop.xlane.xlu1 %726  ;;  %v1433_v6 = vpop.eup %1432  ;;  %1444 = vrsqrt.f32 %v889_v57  ;;  %v856_v9 = vmax.f32 %v840_v58, 0.0  ;;  %v811_v54 = vmul.f32 0.125, %v777_v0  ;;  %v1258_v17 = vmul.f32 -1.442695, %v1959_v8 }
 0x1a2   : > { %v1961_v10 = vmul.f32 0.125, %v727_v1  ;;  %v1435_v15 = vpop.eup %1434  ;;  %1446 = vrcp.f32 %v1020_v7  ;;  %v1021_v16 = vadd.f32 1.0, %v1433_v6  ;;  %v940_v30 = vmul.f32 %v1892_v21, %v917_v23 }
 0x1a3   : > { %v888_v19 = vadd.f32 1e-05, %v856_v9  ;;  %v843_v18 = vsub.f32 %v811_v54, %v827_v60  ;;  %1448 = vpow2.f32 %v1259_v61  ;;  %v916_v14 = vmul.f32 %v1435_v15, %v868_v63 }
 0x1a4   : > { %v775_v22 = vpop.xlane.xlu0 %774  ;;  %1450 = vrcp.f32 %v1021_v16  ;;  %v1966_v25 = vadd.f32 %v1896_v27, %v940_v30  ;;  %v826_v31 = vmul.f32 %v1961_v10, %v1961_v10  ;;  %v873_v63 = vsub.f32 %v1820_v45, %v1926_v35 }
 0x1a5   : > { %v733_v62 = vpop.xlane.xlu1 %732  ;;  %v1437_v26 = vpop.eup %1436  ;;  %1452 = vrsqrt.f32 %v888_v19  ;;  %v859_v29 = vmax.f32 %v843_v18, 0.0  ;;  %v810_v32 = vmul.f32 0.125, %v775_v22  ;;  %v939_v37 = vmul.f32 %v1892_v21, %v916_v14 }
 0x1a6   : > { %v1439_v44 = vpop.eup %1438  ;;  %v1023_v36 = vadd.f32 1.0, %v1437_v26  ;;  %1454 = vpow2.f32 %v1258_v17  ;;  %v1261_v40 = vmul.f32 -1.442695, %v1966_v25  ;;  %v1979_v38 = vmul.f32 0.125, %v733_v62 }
 0x1a7   : > { %v891_v39 = vadd.f32 1e-05, %v859_v29  ;;  %v842_v59 = vsub.f32 %v810_v32, %v826_v31  ;;  %v1977_v48 = vadd.f32 %v1896_v27, %v939_v37  ;;  %v919_v49 = vmul.f32 %v1439_v44, %v871_v34 }
 0x1a8   : > { %v779_v46 = vpop.xlane.xlu0 %778  ;;  %1456 = vrcp.f32 %v1023_v36  ;;  %v1441_v53 = vpop.eup %1440  ;;  %v829_v0 = vmul.f32 %v1979_v38, %v1979_v38  ;;  %v872_v62 = vsub.f32 %v1829_v55, %v1937_v13 }
 0x1a9   : > { %v731_v43 = vpop.xlane.xlu1 %730  ;;  %1458 = vrsqrt.f32 %v891_v39  ;;  %v858_v33 = vmax.f32 %v842_v59, 0.0  ;;  %v812_v24 = vmul.f32 0.125, %v779_v46  ;;  %v1022_v57 = vadd.f32 1.0, %v1441_v53 }
 0x1aa   : > { %v1981_v51 = vmul.f32 0.125, %v731_v43  ;;  %v1443_v3 = vpop.eup %1442  ;;  %v1260_v58 = vmul.f32 -1.442695, %v1977_v48  ;;  %v942_v42 = vmul.f32 %v1892_v21, %v919_v49  ;;  %1460 = vpow2.f32 %v1261_v40 }
 0x1ab   : > { %v890_v52 = vadd.f32 1e-05, %v858_v33  ;;  %v918_v61 = vmul.f32 %v1443_v3, %v870_v41  ;;  %1462 = vrcp.f32 %v1022_v57  ;;  %v875_v59 = vsub.f32 %v1832_v56, %v1948_v20 }
 0x1ac   : > { %v828_v60 = vmul.f32 %v1981_v51, %v1981_v51  ;;  %v1992_v7 = vadd.f32 %v1896_v27, %v942_v42  ;;  %v874_v33 = vsub.f32 %v1841_v2, %v1961_v10 }
 0x1ad   : > { %v781_v1 = vpop.xlane.xlu1 %780  ;;  %1464 = vrsqrt.f32 %v890_v52  ;;  %v941_v9 = vmul.f32 %v1892_v21, %v918_v61 }
 0x1ae   : > { %v844_v23 = vsub.f32 %v812_v24, %v828_v60  ;;  %v813_v6 = vmul.f32 0.125, %v781_v1  ;;  %v1445_v54 = vpop.eup %1444  ;;  %1466 = vpow2.f32 %v1260_v58  ;;  %v1263_v15 = vmul.f32 -1.442695, %v1992_v7 }
 0x1af   : > { %v1447_v16 = vpop.eup %1446  ;;  %v1997_v35 = vadd.f32 %v1896_v27, %v941_v9  ;;  %v921_v30 = vmul.f32 %v1445_v54, %v873_v63 }
 0x1b0   : > { %v860_v17 = vmax.f32 %v844_v23, 0.0  ;;  %v845_v45 = vsub.f32 %v813_v6, %v829_v0  ;;  %v1449_v19 = vpop.eup %1448  ;;  %v1068_v18 = vmul.f32 %v1447_v16, %v1906_v12  ;;  %1468 = vpow2.f32 %v1263_v15 }
 0x1b1   : > { %v1451_v22 = vpop.eup %1450  ;;  %v1262_v29 = vmul.f32 -1.442695, %v1997_v35  ;;  %v944_v32 = vmul.f32 %v1892_v21, %v921_v30  ;;  %v1025_v36 = vadd.f32 1.0, %v1449_v19  ;;  %v877_v6 = vsub.f32 %v1844_v4, %v1979_v38 }
 0x1b2   : > { %v892_v14 = vadd.f32 1e-05, %v860_v17  ;;  %v861_v26 = vmax.f32 %v845_v45, 0.0  ;;  %v1453_v31 = vpop.eup %1452  ;;  %1084 = vxpose.xlu0.b32.start [1/16] (narrow) %v1068_v18, 8  ;;  %v1069_v12 = vmul.f32 %v1451_v22, %v1913_v50 }
 0x1b3   : > { %v1455_v44 = vpop.eup %1454  ;;  %v920_v37 = vmul.f32 %v1453_v31, %v872_v62  ;;  %v2006_v55 = vadd.f32 %v1896_v27, %v944_v32 }
 0x1b4   : > { %1470 = vrsqrt.f32 %v892_v14  ;;  %v893_v34 = vadd.f32 1e-05, %v861_v26  ;;  %v1024_v39 = vadd.f32 1.0, %v1455_v44 }
 0x1b5   : > { %1472 = vpow2.f32 %v1262_v29  ;;  %v1457_v13 = vpop.eup %1456  ;;  %v943_v40 = vmul.f32 %v1892_v21, %v920_v37  ;;  %v1265_v49 = vmul.f32 -1.442695, %v2006_v55 }
 0x1b6   : > { %1474 = vrsqrt.f32 %v893_v34  ;;  %v1459_v41 = vpop.eup %1458  ;;  %1085 = vxpose.xlu0.b32.cont [2/16] (narrow) %v1069_v12, 8  ;;  %v1071_v2 = vmul.f32 %v1457_v13, %v1924_v11 }
 0x1b7   : > { %1476 = vrcp.f32 %v1024_v39  ;;  %v2012_v43 = vadd.f32 %v1896_v27, %v943_v40  ;;  %v923_v46 = vmul.f32 %v1459_v41, %v875_v59  ;;  %v1461_v50 = vpop.eup %1460 }
 0x1b8   : > { %1478 = vrcp.f32 %v1025_v36  ;;  %v1463_v53 = vpop.eup %1462  ;;  %v1027_v60 = vadd.f32 1.0, %v1461_v50 }
 0x1b9   : > { %v1264_v56 = vmul.f32 -1.442695, %v2012_v43  ;;  %v946_v20 = vmul.f32 %v1892_v21, %v923_v46  ;;  %v1070_v24 = vmul.f32 %v1463_v53, %v1935_v28  ;;  %v876_v28 = vsub.f32 %v1848_v5, %v1981_v51 }
 0x1ba   : > { %v1465_v3 = vpop.eup %1464 }
 0x1bb   : > { %v1467_v57 = vpop.eup %1466  ;;  %1480 = vpow2.f32 %v1264_v56  ;;  %v922_v58 = vmul.f32 %v1465_v3, %v874_v33  ;;  %v2021_v42 = vadd.f32 %v1896_v27, %v946_v20  ;;  %1086 = vxpose.xlu0.b32.cont [3/16] (narrow) %v1070_v24, 8 }
 0x1bc   : > { %v1026_v52 = vadd.f32 1.0, %v1467_v57  ;;  %1482 = vpow2.f32 %v1265_v49 }
 0x1bd   : > { %v945_v61 = vmul.f32 %v1892_v21, %v922_v58  ;;  %v1267_v10 = vmul.f32 -1.442695, %v2021_v42  ;;  %v1469_v63 = vpop.eup %1468 }
 0x1be   : > { %1484 = vrcp.f32 %v1026_v52  ;;  %v1029_v45 = vadd.f32 1.0, %v1469_v63 }
 0x1bf   : > { %v2029_v0 = vadd.f32 %v1896_v27, %v945_v61  ;;  %1087 = vxpose.xlu0.b32.cont [4/16] (narrow) %v1071_v2, 8  ;;  %1486 = vrcp.f32 %v1027_v60 }
 0x1c0   : > { %1488 = vpow2.f32 %v1267_v10 }
 0x1c1   : > { %v1471_v1 = vpop.eup %1470  ;;  %v1266_v9 = vmul.f32 -1.442695, %v2029_v0 }
 0x1c2   : > { %v1473_v23 = vpop.eup %1472  ;;  %v924_v11 = vmul.f32 %v1471_v1, %v876_v28 }
 0x1c3   : > { %v1475_v54 = vpop.eup %1474  ;;  %v1028_v15 = vadd.f32 1.0, %v1473_v23  ;;  %1490 = vpow2.f32 %v1266_v9 }
 0x1c4   : > { %v1477_v16 = vpop.eup %1476  ;;  %v947_v5 = vmul.f32 %v1892_v21, %v924_v11  ;;  %v925_v51 = vmul.f32 %v1475_v54, %v877_v6 }
 0x1c5   : > { %v1072_v17 = vmul.f32 %v1477_v16, %v1959_v8  ;;  %1492 = vrcp.f32 %v1028_v15  ;;  %v1479_v30 = vpop.eup %1478 }
 0x1c6   : > { %v970_v19 = vadd.f32 %v1896_v27, %v947_v5  ;;  %v948_v4 = vmul.f32 %v1892_v21, %v925_v51  ;;  %v1073_v62 = vmul.f32 %v1479_v30, %v1946_v47  ;;  %1494 = vrcp.f32 %v1029_v45 }
 0x1c7   : > { %1088 = vxpose.xlu0.b32.cont [5/16] (narrow) %v1072_v17, 8 }
 0x1c8   : > { %v1268_v38 = vmul.f32 -1.442695, %v970_v19  ;;  %v971_v18 = vadd.f32 %v1896_v27, %v948_v4  ;;  %v1481_v22 = vpop.eup %1480 }
 0x1c9   : > { %v1483_v14 = vpop.eup %1482  ;;  %v1030_v26 = vadd.f32 1.0, %v1481_v22 }
 0x1ca   : > { %1496 = vpow2.f32 %v1268_v38  ;;  %v1269_v29 = vmul.f32 -1.442695, %v971_v18  ;;  %v1031_v32 = vadd.f32 1.0, %v1483_v14 }
 0x1cb   : > { %1089 = vxpose.xlu0.b32.cont [6/16] (narrow) %v1073_v62, 8  ;;  %v1485_v8 = vpop.eup %1484  ;;  %1498 = vrcp.f32 %v1030_v26 }
 0x1cc   : > { %v1074_v31 = vmul.f32 %v1485_v8, %v1977_v48  ;;  %1500 = vpow2.f32 %v1269_v29  ;;  %v1487_v21 = vpop.eup %1486 }
 0x1cd   : > { %v1489_v44 = vpop.eup %1488  ;;  %v1075_v27 = vmul.f32 %v1487_v21, %v1966_v25  ;;  %1502 = vrcp.f32 %v1031_v32 }
 0x1ce   : > { %v1033_v12 = vadd.f32 1.0, %v1489_v44 }
 0x1cf   : > { %1090 = vxpose.xlu0.b32.cont [7/16] (narrow) %v1074_v31, 8 }
 0x1d0   : > { %v1491_v34 = vpop.eup %1490 }
 0x1d1   : > { %v1032_v36 = vadd.f32 1.0, %v1491_v34 }
 0x1d2   : > { %v1493_v47 = vpop.eup %1492 }
 0x1d3   : > { %1091 = vxpose.xlu0.b32.cont [8/16] (narrow) %v1075_v27, 8  ;;  %v1076_v37 = vmul.f32 %v1493_v47, %v1997_v35  ;;  %1504 = vrcp.f32 %v1032_v36  ;;  %v1495_v39 = vpop.eup %1494 }
 0x1d4   : > { %v1077_v59 = vmul.f32 %v1495_v39, %v1992_v7  ;;  %1506 = vrcp.f32 %v1033_v12 }
 0x1d7   : > { %v1497_v13 = vpop.eup %1496  ;;  %1092 = vxpose.xlu0.b32.cont [9/16] (narrow) %v1076_v37, 8 }
 0x1d8   : > { %v1499_v48 = vpop.eup %1498  ;;  %v1034_v40 = vadd.f32 1.0, %v1497_v13 }
 0x1d9   : > { %v1501_v41 = vpop.eup %1500  ;;  %v1078_v25 = vmul.f32 %v1499_v48, %v2012_v43 }
 0x1da   : > { %1508 = vrcp.f32 %v1034_v40  ;;  %v1035_v46 = vadd.f32 1.0, %v1501_v41  ;;  %v1503_v50 = vpop.eup %1502 }
 0x1db   : > { %1093 = vxpose.xlu0.b32.cont [10/16] (narrow) %v1077_v59, 8  ;;  %v1079_v49 = vmul.f32 %v1503_v50, %v2006_v55 }
 0x1dc   : > { %1510 = vrcp.f32 %v1035_v46 }
 0x1df   : > { %1094 = vxpose.xlu0.b32.cont [11/16] (narrow) %v1078_v25, 8 }
 0x1e0   : > { %v1505_v35 = vpop.eup %1504 }
 0x1e1   : > { %v1080_v53 = vmul.f32 %v1505_v35, %v2029_v0  ;;  %v1507_v7 = vpop.eup %1506 }
 0x1e2   : > { %v1081_v33 = vmul.f32 %v1507_v7, %v2021_v42 }
 0x1e3   : > { %1095 = vxpose.xlu0.b32.cont [12/16] (narrow) %v1079_v49, 8 }
 0x1e7   : > { %1096 = vxpose.xlu0.b32.cont [13/16] (narrow) %v1080_v53, 8  ;;  %v1509_v56 = vpop.eup %1508 }
 0x1e8   : > { %v1082_v43 = vmul.f32 %v1509_v56, %v970_v19 }
 0x1e9   : > { %v1511_v20 = vpop.eup %1510 }
 0x1ea   : > { %v1083_v3 = vmul.f32 %v1511_v20, %v971_v18 }
 0x1eb   : > { %1097 = vxpose.xlu0.b32.cont [14/16] (narrow) %v1081_v33, 8 }
 0x1ef   : > { %1098 = vxpose.xlu0.b32.cont [15/16] (narrow) %v1082_v43, 8 }
 0x1f3   : > { %1099 = vxpose.xlu0.b32.end [16/16] (narrow) %v1083_v3, 8 }
 0x233   : > { %v1100_v55 = vpop.trf.xlu0 }
 0x234   : > { %1116 = vst [vmem:[%s242_s10] sm:$0xff] %v1100_v55 }
 0x235   : > { %1525 = shalt.err (!%p1522_p5)
}
 0x236   : > { %s1526_s27 = scalar_lea.hbm %s1130_s15, 128  ;;  %s1530_s8 = scalar_lea.hbm %s2098_s5, 256 }
 0x237   : > { %p1527_p6 = scmp.ne.s32.totalorder %s1130_s15, %s1526_s27  ;;  %p1531_p10 = scmp.lt.s32.totalorder %s1130_s15, %s2098_s5 }
 0x238   : > { %p1532_p11 = scmp.lt.s32.totalorder %s1530_s8, %s1526_s27 }
 0x239   : > { %p1528_p7 = pnand %p1527_p6, %p1661_p4 }
 0x23a   : > { %p1533_p12 = por %p1532_p11, %p1531_p10 }
 0x23b   : > { %p1529_p9 = pneg %p1528_p7 }
 0x23d   : > { %p1534_p13 = pnand %p1533_p12, %p1529_p9 }
 0x23f   : > { %1537 = shalt.err (!%p1534_p13)
}
 0x240   : > { %1361 = dma.vmem_to_hbm [thread:$0]  (%p1661_p4), %s2050_s11, 128, %s1130_s15, %s1118_s16  }
 0x241 PF: > { %p1367_p0 = scmp.ge.s32.totalorder %s1588_s23, 2  ;;  %s1144_s12 = sand.u32 1, %s1568_s18  }
 0x242   : > { %s1145_s13 = scalar_lea.sflag [#allocation3], %s1144_s12 }
 0x243   : > { %p1364_p1 = pnand %p1367_p0, %p1668_p8 }
 0x245   : > { %p1365_p2 = pneg %p1364_p1 }
 0x247   : > { %1563 = dma.done.wait (%p1365_p2), %s1145_s13, 128  }
 0x248   : > { %1565 = vsyncadd (%p1365_p2), %s1145_s13, 4294967168  ;;  %s18_s23 = sadd.s32 1, %s1588_s23   ;;  %s2101_s18 = smov %s1572_s19 }
 0x249   : > { %p15_p3 = scmp.ge.s32.totalorder %s18_s23, 4   ;;  %s2102_s19 = smov %s1576_s20 }
 0x24a   : > { %s2103_s20 = smov %s1674_s6  ;;  %s2104_s21 = smov %s1584_s22 }
 0x24b   : > { %s2105_s22 = smov %s2107_s26  ;;  %17 = sbr.rel (!%p15_p3) target bundleno = 4 (0x4), region = 80 }
 0x250   :  { %1150 = vsyncpa [#allocation3], 1 }
 0x251   :  { %1152 = vsyncpa [#allocation3 + $0x1], 1 }

</bundles_post_ra>
